<compile_context>
chip_gen: v7x
topology: tpu7x:2x2x1
jax: 0.10.0
libtpu: 0.0.40
codegen_flags: <defaults>
</compile_context>

<pallas_src>
import functools

import jax
import jax.numpy as jnp
from jax.experimental import pallas as pl
from jax.experimental.pallas import tpu as pltpu


def _rmsnorm_kernel(x_ref, w_ref, o_ref, *, eps: float, inv_dim: float):
    # Upcast to f32 for the reduction (matches `inputs.to(torch.float32)`).
    x = x_ref[...].astype(jnp.float32)                    # (tm, Dp)
    # Zero-padded lanes contribute 0 to the sum, so divide by the *true* dim.
    ssq = jnp.sum(x * x, axis=-1, keepdims=True)          # (tm, 1)
    inv = jax.lax.rsqrt(ssq * inv_dim + eps)              # (tm, 1)  (EUP)
    w = w_ref[...].astype(jnp.float32)                    # (1, Dp)
    o_ref[...] = (w * (x * inv)).astype(o_ref.dtype)      # cast back to input dtype


def _vmem_budget_bytes():
    """Return (block_budget_bytes, vmem_limit_bytes), generation-aware."""
    phys = 64 << 20  # conservative default = v7x per-TC VMEM
    try:
        info = pltpu.get_tpu_info()
        phys = int(getattr(info, "vmem_capacity_bytes", phys))
    except Exception:
        pass
    if phys <= (64 << 20) + (1 << 20):
        # v7x (64 MiB/TC): keep double-buffered blocks <= ~40 MiB, headroom for scratch.
        block_budget = 40 << 20
        vmem_limit = max(32 << 20, min(56 << 20, phys - (4 << 20)))
    else:
        # v5e / v6e (128 MiB physical): raise well above the 16/32 MiB scoped default.
        block_budget = 80 << 20
        vmem_limit = 100 << 20
    return block_budget, vmem_limit


def _choose_row_tile(rows, dim_p, dtype_bytes, block_budget_bytes):
    """Largest sublane-aligned row tile whose pipelined blocks fit the budget."""
    # x block + out block, each double-buffered by the Pallas pipeline.
    bytes_per_row = 4 * dim_p * dtype_bytes
    tm = max(8, block_budget_bytes // bytes_per_row)
    tm = min(tm, 2048)  # diminishing returns beyond ~1-2K rows per step
    if rows >= 256:
        # Keep at least 2 grid steps so both v7x TensorCores get work.
        half = -(-rows // 2)
        half = ((half + 7) // 8) * 8
        tm = min(tm, half)
    if tm >= rows:
        return rows
    return max(8, (tm // 8) * 8)


def rmsnorm(x, weight, eps: float, *, donate_input: bool = False):
    """x: (..., dim), weight: (dim,). Returns same shape/dtype as x."""
    orig_shape = x.shape
    dim = orig_shape[-1]
    rows = 1
    for s in orig_shape[:-1]:
        rows *= s

    # Lane-dense hidden dim: pad to a multiple of 128 (zeros do not perturb
    # the sum of squares; we divide by the true dim inside the kernel).
    dim_p = ((dim + 127) // 128) * 128
    x2 = x.reshape(rows, dim)
    w2 = weight.reshape(1, dim)
    if dim_p != dim:
        x2 = jnp.pad(x2, ((0, 0), (0, dim_p - dim)))
        w2 = jnp.pad(w2, ((0, 0), (0, dim_p - dim)))

    dtype_bytes = x.dtype.itemsize
    block_budget, vmem_limit = _vmem_budget_bytes()
    tm = _choose_row_tile(rows, dim_p, dtype_bytes, block_budget)
    grid = (pl.cdiv(rows, tm),)

    cost = pl.CostEstimate(
        flops=4 * rows * dim,
        transcendentals=rows,
        bytes_accessed=rows * dim * 2 * dtype_bytes + dim * weight.dtype.itemsize,
    )

    extra_kwargs = {}
    if donate_input and dim_p == dim:
        extra_kwargs["input_output_aliases"] = {0: 0}

    out = pl.pallas_call(
        functools.partial(_rmsnorm_kernel, eps=eps, inv_dim=1.0 / dim),
        out_shape=jax.ShapeDtypeStruct((rows, dim_p), x.dtype),
        grid_spec=pltpu.PrefetchScalarGridSpec(
            num_scalar_prefetch=0,
            grid=grid,
            in_specs=[
                pl.BlockSpec((tm, dim_p), lambda i: (i, 0)),
                pl.BlockSpec((1, dim_p), lambda i: (0, 0)),
            ],
            out_specs=pl.BlockSpec((tm, dim_p), lambda i: (i, 0)),
        ),
        compiler_params=pltpu.CompilerParams(
            dimension_semantics=("parallel",),
            vmem_limit_bytes=int(vmem_limit),
        ),
        cost_estimate=cost,
        **extra_kwargs,
    )(x2, w2)

    if dim_p != dim:
        out = out[:, :dim]
    return out.reshape(orig_shape)


def rmsnorm_ref(x, weight, eps: float):
    h = x.astype(jnp.float32)
    var = jnp.mean(h * h, axis=-1, keepdims=True)
    h = h * jax.lax.rsqrt(var + eps)
    return (weight.astype(jnp.float32) * h).astype(x.dtype)


if __name__ == "__main__":
    key = jax.random.PRNGKey(0)
    eps = 1e-6

    # Case 1: module-sized small input (exercises sub-128 hidden -> padded path).
    batch, seq, hidden = 2, 8, 32
    k1, k2 = jax.random.split(key)
    x = jax.random.normal(k1, (batch, seq, hidden), dtype=jnp.bfloat16)
    weight = jnp.ones((hidden,), dtype=jnp.float32)  # RMSNorm init: ones(dim)

    out = jax.block_until_ready(rmsnorm(x, weight, eps))
    ref = rmsnorm_ref(x, weight, eps)
    assert out.shape == x.shape and out.dtype == x.dtype
    assert jnp.allclose(out.astype(jnp.float32), ref.astype(jnp.float32),
                        atol=1e-2, rtol=1e-2)

    # Case 2: lane-aligned hidden and multi-step row grid (fast path).
    batch2, seq2, hidden2 = 4, 128, 512
    x2 = jax.random.normal(k2, (batch2, seq2, hidden2), dtype=jnp.bfloat16)
    w2 = jnp.ones((hidden2,), dtype=jnp.float32)
    out2 = jax.block_until_ready(rmsnorm(x2, w2, eps))
    ref2 = rmsnorm_ref(x2, w2, eps)
    assert out2.shape == x2.shape and out2.dtype == x2.dtype
    assert jnp.allclose(out2.astype(jnp.float32), ref2.astype(jnp.float32),
                        atol=1e-2, rtol=1e-2)

    print("KERNEL_OK")
</pallas_src>

<mosaic_0001>
module attributes {stable_mosaic.version = 11 : i64} {
  func.func @_rmsnorm_kernel(%arg0: i32, %arg1: memref<16x128xbf16, #tpu.memory_space<vmem>>, %arg2: memref<1x128xf32, #tpu.memory_space<vmem>>, %arg3: memref<16x128xbf16, #tpu.memory_space<vmem>>) attributes {dimension_semantics = [#tpu.dimension_semantics<parallel>], iteration_bounds = array<i64: 1>, scalar_prefetch = 0 : i64, scratch_operands = 0 : i64, tpu.core_type = #tpu.core_type<tc>, window_params = [{transform_indices = @transform_0, window_bounds = array<i64: 16, 128>}, {pipeline_mode = #tpu.pipeline_mode<synchronous>, transform_indices = @transform_1, window_bounds = array<i64: 1, 128>}, {transform_indices = @transform_2, window_bounds = array<i64: 16, 128>}]} {
    %c0 = arith.constant 0 : index
    %c0_0 = arith.constant 0 : index
    %0 = vector.load %arg1[%c0, %c0_0] : memref<16x128xbf16, #tpu.memory_space<vmem>>, vector<16x128xbf16>
    %1 = arith.extf %0 : vector<16x128xbf16> to vector<16x128xf32>
    %2 = arith.mulf %1, %1 : vector<16x128xf32>
    %cst = arith.constant dense<0.000000e+00> : vector<16xf32>
    %3 = vector.multi_reduction <add>, %2, %cst [1] : vector<16x128xf32> to vector<16xf32>
    %4 = vector.shape_cast %3 : vector<16xf32> to vector<16x1xf32>
    %cst_1 = arith.constant 3.125000e-02 : f32
    %5 = vector.broadcast %cst_1 : f32 to vector<16x1xf32>
    %6 = arith.mulf %4, %5 : vector<16x1xf32>
    %cst_2 = arith.constant 9.99999997E-7 : f32
    %7 = vector.broadcast %cst_2 : f32 to vector<16x1xf32>
    %8 = arith.addf %6, %7 : vector<16x1xf32>
    %9 = math.rsqrt %8 : vector<16x1xf32>
    %c0_3 = arith.constant 0 : index
    %c0_4 = arith.constant 0 : index
    %10 = vector.load %arg2[%c0_3, %c0_4] : memref<1x128xf32, #tpu.memory_space<vmem>>, vector<1x128xf32>
    %11 = vector.broadcast %9 : vector<16x1xf32> to vector<16x128xf32>
    %12 = arith.mulf %1, %11 : vector<16x128xf32>
    %13 = vector.broadcast %10 : vector<1x128xf32> to vector<16x128xf32>
    %14 = arith.mulf %13, %12 : vector<16x128xf32>
    %15 = arith.truncf %14 : vector<16x128xf32> to vector<16x128xbf16>
    %c0_5 = arith.constant 0 : index
    %c0_6 = arith.constant 0 : index
    %16 = vector.load %arg3[%c0_5, %c0_6] : memref<16x128xbf16, #tpu.memory_space<vmem>>, vector<16x128xbf16>
    tpu.vector_store %arg3[%c0_5, %c0_6], %15 {strides = array<i32>} : memref<16x128xbf16, #tpu.memory_space<vmem>>, vector<16x128xbf16>,
    return
  }
  func.func @transform_0(%arg0: i32) -> (i32, i32) {
    %c0_i32 = arith.constant 0 : i32
    %c0_i32_0 = arith.constant 0 : i32
    return %arg0, %c0_i32 : i32, i32
  }
  func.func @transform_1(%arg0: i32) -> (i32, i32) {
    %c0_i32 = arith.constant 0 : i32
    %c0_i32_0 = arith.constant 0 : i32
    %c0_i32_1 = arith.constant 0 : i32
    return %c0_i32, %c0_i32_0 : i32, i32
  }
  func.func @transform_2(%arg0: i32) -> (i32, i32) {
    %c0_i32 = arith.constant 0 : i32
    %c0_i32_0 = arith.constant 0 : i32
    return %arg0, %c0_i32 : i32, i32
  }
}

</mosaic_0001>

<bundles_post_ra>
// kernel: tpu_custom_call.1
= control target key start
LH: loop header
LB: loop body
LE: loop exit
PB: predicated region body
PF: predicated region fallthrough
CT: control target
= control target key end

     0   :  { %7 = vsyncpa [#allocation3], 0  ;;  %s202_s0 = inlined_call_operand.hbm [shape: bf16[16,128], index: 0, kind: input, shape index: {}]   ;;  %s203_s1 = inlined_call_operand.vmem [shape: f32[1,128], index: 1, kind: input, shape index: {}]   ;;  %s204_s2 = inlined_call_operand.hbm [shape: bf16[16,128], index: 2, kind: output, shape index: {}]  }
   0x1   :  { %8 = vsyncpa [#allocation4], 0  ;;  %s150_s9 = smov [#allocation2]   ;;  %s102_s13 = scalar_lea.hbm %s202_s0, 128 }
   0x2   :  { %s14_s10 = sshll.u32 %s150_s9, 4  ;;  %p103_p0 = scmp.ne.s32.totalorder %s202_s0, %s102_s13  ;;  %s15_s10 = int_to_ptr.vmem [resolvable:$true] %s14_s10 }
   0x3   :  { %p106_p1 = scmp.lt.u32.totalorder %s102_s13, %s202_s0 }
   0x5   :  { %p108_p2 = pnand %p106_p1, %p103_p0 }
   0x7   :  { %111 = shalt.err (!%p108_p2)
}
   0x8   :  { %s112_s18 = scalar_lea.vmem %s15_s10, 128  ;;  %p117_p4 = scmp.lt.s32.totalorder %s15_s10, %s15_s10 }
   0x9   :  { %p113_p3 = scmp.ne.s32.totalorder %s15_s10, %s112_s18  ;;  %p118_p5 = scmp.lt.s32.totalorder %s112_s18, %s112_s18 }
   0xb   :  { %p119_p6 = por %p118_p5, %p117_p4 }
   0xd   :  { %p120_p7 = pnand %p119_p6, %p113_p3 }
   0xf   :  { %123 = shalt.err (!%p120_p7)
}
  0x10   :  { %s151_s19 = smov 64   ;;  %s152_s20 = smov 4  }
  0x11   :  { %20 = dma.hbm_to_vmem [thread:$0]  %s202_s0, 128, %s15_s10, [#allocation3], %s151_s19, %s151_s19, %s152_s20  }
  0x12   :  { %146 = dma.done.wait [#allocation3], 128  }
  0x13   :  { %147 = vsyncadd [#allocation3], 4294967168  ;;  %v86_v0 = vld [vmem:[#allocation2] sm:$0xff]   ;;  %s153_s24 = smov [#allocation5]  }
  0x14   :  { %v87_v1 = vunpack.c.l.bf16 %v86_v0  ;;  %v88_v2 = vunpack.c.h.bf16 %v86_v0  ;;  %v80_v14 = vld [vmem:[%s203_s1] ss:$0 sm:$0xff]  ;;  %s68_s25 = sshll.u32 %s153_s24, 4  ;;  %s69_s25 = int_to_ptr.vmem [resolvable:$true] %s68_s25 }
  0x15   :  { %s124_s26 = scalar_lea.vmem %s69_s25, 128  ;;  %p129_p9 = scmp.lt.s32.totalorder %s69_s25, %s69_s25 }
  0x16   :  { %v30_v3 = vmul.f32 %v87_v1, %v87_v1  ;;  %v31_v4 = vmul.f32 %v88_v2, %v88_v2  ;;  %p125_p8 = scmp.ne.s32.totalorder %s69_s25, %s124_s26  ;;  %p130_p10 = scmp.lt.s32.totalorder %s124_s26, %s124_s26 }
  0x18   :  { %32 = vadd.xlane.f32.xlu0 %v30_v3  ;;  %p131_p11 = por %p130_p10, %p129_p9 }
  0x1a   :  { %p132_p12 = pnand %p131_p11, %p125_p8 }
  0x1c   :  { %34 = vadd.xlane.f32.xlu0 %v31_v4 }
  0xa5   :  { %v33_v5 = vpop.xlane.xlu0 %32 }
  0xa6   :  { %v36_v6 = vmul.f32 0.03125, %v33_v5 }
  0xa8   :  { %v38_v7 = vadd.f32 1e-06, %v36_v6 }
  0xa9   :  { %v35_v8 = vpop.xlane.xlu0 %34 }
  0xaa   :  { %98 = vrsqrt.f32 %v38_v7  ;;  %v37_v9 = vmul.f32 0.03125, %v35_v8 }
  0xac   :  { %v39_v10 = vadd.f32 1e-06, %v37_v9 }
  0xae   :  { %100 = vrsqrt.f32 %v39_v10 }
  0xb4   :  { %v99_v11 = vpop.eup %98 }
  0xb5   :  { %v43_v12 = vmul.f32 %v99_v11, %v87_v1 }
  0xb7   :  { %v51_v16 = vmul.f32 %v80_v14, %v43_v12 }
  0xb8   :  { %v101_v13 = vpop.eup %100 }
  0xb9   :  { %v44_v15 = vmul.f32 %v101_v13, %v88_v2 }
  0xbb   :  { %v52_v17 = vmul.f32 %v80_v14, %v44_v15 }
  0xbd   :  { %v92_v18 = vpack.c.bf16 %v52_v17, %v51_v16 }
  0xbf   :  { %93 = vst [vmem:[#allocation5] sm:$0xff] %v92_v18  }
  0xc0   :  { %135 = shalt.err (!%p132_p12)
}
  0xc1   :  { %s136_s29 = scalar_lea.hbm %s204_s2, 128 }
  0xc2   :  { %p137_p13 = scmp.ne.s32.totalorder %s204_s2, %s136_s29  ;;  %p140_p0 = scmp.lt.u32.totalorder %s136_s29, %s204_s2 }
  0xc4   :  { %p142_p1 = pnand %p140_p0, %p137_p13 }
  0xc6   :  { %145 = shalt.err (!%p142_p1)
}
  0xc7   :  { %74 = dma.vmem_to_hbm [thread:$0]  %s69_s25, 128, %s204_s2, [#allocation4], %s151_s19, %s151_s19, %s152_s20  }
  0xc8   :  { %148 = dma.done.wait [#allocation4], 128  }
  0xc9   :  { %149 = vsyncadd [#allocation4], 4294967168 }
  0xca   :  { %78 = vsyncpa [#allocation3], 1 }
  0xcb   :  { %79 = vsyncpa [#allocation4], 1 }

</bundles_post_ra>
